<compile_context>
chip_gen: v7x
topology: tpu7x:2x2x1
jax: 0.10.0
libtpu: 0.0.40
codegen_flags: <defaults>
</compile_context>

<pallas_src>
import math

import jax
import jax.numpy as jnp
from jax import lax
from jax.experimental import pallas as pl
from jax.experimental.pallas import tpu as pltpu

_LANE = 128
_SUBLANE = 8


def _round_up(x, m):
    return ((x + m - 1) // m) * m


def _pad2(a, rows, cols):
    a = jnp.asarray(a, jnp.float32)
    return jnp.pad(a, ((0, rows - a.shape[0]), (0, cols - a.shape[1])))


def _vmem_limit_bytes():
    # Generation-aware: ~3/4 of physical VMEM (v5e/v6e: ~96 MiB, v7x: ~48 MiB).
    try:
        cap = int(pltpu.get_tpu_info().vmem_capacity_bytes)
    except Exception:
        cap = 64 * 1024 * 1024
    return min((cap * 3) // 4, 100 * 1024 * 1024)


def _cparams():
    return pltpu.CompilerParams(
        dimension_semantics=("parallel",),
        vmem_limit_bytes=_vmem_limit_bytes())


def _const_spec(shape):
    return pl.BlockSpec(shape, lambda i, _n=len(shape): (0,) * _n)


# ----------------------------------------------------------------------------
# Pallas kernels
# ----------------------------------------------------------------------------
def _pre_dual_linear_kernel(x_ref, wpre_ref, bpre_ref, wm_ref, wf_ref, bh_ref,
                            fm_ref, ff_ref):
    """feat = x @ Wpre + bpre ; FM = feat @ Wm ; FF = feat @ Wf + bh."""
    feat = (jnp.dot(x_ref[...], wpre_ref[...],
                    preferred_element_type=jnp.float32) + bpre_ref[...])
    fm_ref[...] = jnp.dot(feat, wm_ref[...], preferred_element_type=jnp.float32)
    ff_ref[...] = (jnp.dot(feat, wf_ref[...],
                           preferred_element_type=jnp.float32) + bh_ref[...])


def _dual_linear_kernel(x_ref, wm_ref, wf_ref, bh_ref, fm_ref, ff_ref):
    """FM = x @ Wm ; FF = x @ Wf + bh."""
    x = x_ref[...]
    fm_ref[...] = jnp.dot(x, wm_ref[...], preferred_element_type=jnp.float32)
    ff_ref[...] = (jnp.dot(x, wf_ref[...],
                           preferred_element_type=jnp.float32) + bh_ref[...])


def _layer_epilogue(gathered, dnew_ref, ff_ref, wp_ref, bp_ref,
                    pos_ref, struct_ref):
    tn, K = dnew_ref.shape
    Dp = ff_ref.shape[1]
    # hidden = relu(d_new * FM[idx] + (feat @ Wf + bh))            [tn, K, Dp]
    hidden = jnp.maximum(
        gathered.reshape(tn, K, Dp) * dnew_ref[...][:, :, None]
        + ff_ref[...][:, None, :],
        0.0)
    # out_position: VPU multiply + lane reduce (no output-width-1 MXU pass),
    # stored directly as a [tn, K] block (pos is tiny; masked store is cheap).
    pos_ref[...] = (jnp.sum(hidden * wp_ref[...].reshape(1, 1, Dp), axis=-1)
                    + bp_ref[...])
    # out_structure: mean over the anchor-set dimension.
    struct_ref[...] = jnp.mean(hidden, axis=1)


def _pgnn_layer_kernel_take(idx_ref, dnew_ref, ff_ref, wp_ref, bp_ref, fm_ref,
                            pos_ref, struct_ref):
    tn, K = idx_ref.shape
    # Exact row gather from the VMEM-resident [Np, Dp] message matrix.
    gathered = jnp.take(fm_ref[...], idx_ref[...].reshape(tn * K), axis=0,
                        mode="clip")
    _layer_epilogue(gathered, dnew_ref, ff_ref, wp_ref, bp_ref,
                    pos_ref, struct_ref)


def _pgnn_layer_kernel_onehot(idx_ref, dnew_ref, ff_ref, wp_ref, bp_ref, fm_ref,
                              pos_ref, struct_ref):
    # Fallback gather: one-hot matmul on the MXU.  Quadratic in N; only used
    # if the in-kernel jnp.take gather cannot be lowered on this build.
    tn, K = idx_ref.shape
    Np, _ = fm_ref.shape
    idx_col = idx_ref[...].reshape(tn * K, 1)
    onehot = (lax.broadcasted_iota(jnp.int32, (tn * K, Np), 1) == idx_col
              ).astype(jnp.float32)
    gathered = jnp.dot(onehot, fm_ref[...], preferred_element_type=jnp.float32)
    _layer_epilogue(gathered, dnew_ref, ff_ref, wp_ref, bp_ref,
                    pos_ref, struct_ref)


# ----------------------------------------------------------------------------
# pallas_call wrappers
# ----------------------------------------------------------------------------
def fused_linears(xp, wm, wf, bh, *, tn, wpre=None, bpre=None):
    """FM = feat @ Wm, FF = feat @ Wf + bh, with feat = xp (@ Wpre + bpre)."""
    Np, Din = xp.shape
    Dp = wm.shape[1]
    x_spec = pl.BlockSpec((tn, Din), lambda i: (i, 0))
    if wpre is None:
        kernel = _dual_linear_kernel
        operands = (xp, wm, wf, bh)
        in_specs = [x_spec, _const_spec(wm.shape), _const_spec(wf.shape),
                    _const_spec(bh.shape)]
    else:
        kernel = _pre_dual_linear_kernel
        operands = (xp, wpre, bpre, wm, wf, bh)
        in_specs = [x_spec, _const_spec(wpre.shape), _const_spec(bpre.shape),
                    _const_spec(wm.shape), _const_spec(wf.shape),
                    _const_spec(bh.shape)]
    return pl.pallas_call(
        kernel,
        out_shape=(jax.ShapeDtypeStruct((Np, Dp), jnp.float32),
                   jax.ShapeDtypeStruct((Np, Dp), jnp.float32)),
        grid=(Np // tn,),
        in_specs=in_specs,
        out_specs=(pl.BlockSpec((tn, Dp), lambda i: (i, 0)),
                   pl.BlockSpec((tn, Dp), lambda i: (i, 0))),
        compiler_params=_cparams(),
    )(*operands)


def _pgnn_layer_call(kernel, idx_p, dnew_p, ff, fm, wp, bp, *, tn):
    Np, Dp = fm.shape
    K = idx_p.shape[1]
    return pl.pallas_call(
        kernel,
        out_shape=(jax.ShapeDtypeStruct((Np, K), jnp.float32),
                   jax.ShapeDtypeStruct((Np, Dp), jnp.float32)),
        grid=(Np // tn,),
        in_specs=[
            pl.BlockSpec((tn, K), lambda i: (i, 0)),   # dists_argmax tile
            pl.BlockSpec((tn, K), lambda i: (i, 0)),   # dist_compute(d) tile
            pl.BlockSpec((tn, Dp), lambda i: (i, 0)),  # FF tile
            _const_spec((1, Dp)),                      # pos weight row
            _const_spec((1, 1)),                       # pos bias
            _const_spec((Np, Dp)),                     # FM (VMEM resident)
        ],
        out_specs=(pl.BlockSpec((tn, K), lambda i: (i, 0)),
                   pl.BlockSpec((tn, Dp), lambda i: (i, 0))),
        compiler_params=_cparams(),
    )(idx_p, dnew_p, ff, wp, bp, fm)


_TAKE_GATHER_OK = [True]


def pgnn_layer(idx_p, dnew_p, ff, fm, wp, bp, *, tn):
    if _TAKE_GATHER_OK[0]:
        try:
            return _pgnn_layer_call(_pgnn_layer_kernel_take,
                                    idx_p, dnew_p, ff, fm, wp, bp, tn=tn)
        except Exception:
            # TODO(synk): this Mosaic build cannot lower the in-kernel row
            # gather; fall back to the (quadratic) one-hot matmul gather.
            _TAKE_GATHER_OK[0] = False
    return _pgnn_layer_call(_pgnn_layer_kernel_onehot,
                            idx_p, dnew_p, ff, fm, wp, bp, tn=tn)


# ----------------------------------------------------------------------------
# Non-kernel pieces
# ----------------------------------------------------------------------------
def dist_mlp(dists_max, dp):
    """Nonlinear(1, D, 1) per (node, anchor) in plain XLA (hoisted out of the
    kernel per the perf review: lane-sparse, negligible FLOPs)."""
    w1 = jnp.asarray(dp["w1"], jnp.float32).reshape(-1)   # [D]
    b1 = jnp.asarray(dp["b1"], jnp.float32)               # [D]
    w2 = jnp.asarray(dp["w2"], jnp.float32).reshape(-1)   # [D]
    b2 = jnp.asarray(dp["b2"], jnp.float32).reshape(())
    h = jnp.maximum(dists_max[..., None] * w1 + b1, 0.0)  # [N, K, D]
    return jnp.tensordot(h, w2, axes=([-1], [0])) + b2    # [N, K]


def l2_normalize(x, axis=-1, eps=1e-12):
    # matches torch.nn.functional.normalize(p=2)
    norm = jnp.sqrt(jnp.sum(x * x, axis=axis, keepdims=True))
    return x / jnp.maximum(norm, eps)


def prepare_params(params):
    """Pad / transpose all weights once (outside the per-call trace)."""
    in_dim = params["pre_w"].shape[1]
    f_dim = params["pre_b"].shape[0]
    h_dim = params["conv_first"]["hidden_b"].shape[0]
    c_dim = params["conv_out"]["hidden_b"].shape[0]
    in_p, f_p, h_p, c_p = (_round_up(v, _LANE)
                           for v in (in_dim, f_dim, h_dim, c_dim))

    def layer(p, fin, fin_p, dout, dout_p):
        hw = jnp.asarray(p["hidden_w"], jnp.float32)          # [dout, 2*fin]
        return dict(
            wm=_pad2(hw[:, :fin].T, fin_p, dout_p),            # message half
            wf=_pad2(hw[:, fin:].T, fin_p, dout_p),            # self-feat half
            bh=_pad2(p["hidden_b"].reshape(1, dout), 1, dout_p),
            wp=_pad2(p["pos_w"], 1, dout_p),                   # [1, dout_p]
            bp=_pad2(p["pos_b"].reshape(1, 1), 1, 1),
            dist=dict(w1=p["dist_w1"], b1=p["dist_b1"],
                      w2=p["dist_w2"], b2=p["dist_b2"]),
        )

    return dict(
        in_dim=in_dim, in_p=in_p,
        wpre=_pad2(jnp.asarray(params["pre_w"], jnp.float32).T, in_p, f_p),
        bpre=_pad2(params["pre_b"].reshape(1, f_dim), 1, f_p),
        conv_first=layer(params["conv_first"], f_dim, f_p, h_dim, h_p),
        conv_out=layer(params["conv_out"], h_dim, h_p, c_dim, c_p),
    )


def _choose_tiling(n, k, tn_max=256):
    n8 = _round_up(max(n, 1), _SUBLANE)
    if n8 > _SUBLANE:
        # >= 2 node tiles whenever possible so v7x's 2 TensorCores both get work.
        tn = _round_up((n + 1) // 2, _SUBLANE)
    else:
        tn = n8
    # Keep per-tile [tn, K, Dp] intermediates modest (v7x has 64 MiB VMEM).
    tn = min(tn, tn_max, _round_up(max(4096 // max(k, 1), _SUBLANE), _SUBLANE))
    tn = max(tn, _SUBLANE)
    return tn, _round_up(n, tn)


def pgnn_forward(prepped, x, dists_max, dists_argmax, *, tn_max=256):
    """PGNN.forward (feature_pre=True, layer_num=2, node_classification with
    n_nodes given -> returns the L2-normalized x_position, shape [N, K]).

    NOTE: padded node rows [N, Np) carry garbage hidden/struct values, but
    they are never gathered (dists_argmax < N) and are sliced off at the end.
    """
    assert x.shape[1] == prepped["in_dim"]
    n = x.shape[0]
    k = dists_max.shape[1]
    tn, np_ = _choose_tiling(n, k, tn_max)

    xp = _pad2(x, np_, prepped["in_p"])
    idx_p = jnp.pad(jnp.asarray(dists_argmax, jnp.int32),
                    ((0, np_ - n), (0, 0)))
    dmax = jnp.asarray(dists_max, jnp.float32)

    # ---- conv_first (linear_pre fused into the FM/FF pre-compute) ----
    p1 = prepped["conv_first"]
    d1 = jnp.pad(dist_mlp(dmax, p1["dist"]), ((0, np_ - n), (0, 0)))
    fm1, ff1 = fused_linears(xp, p1["wm"], p1["wf"], p1["bh"], tn=tn,
                             wpre=prepped["wpre"], bpre=prepped["bpre"])
    _, struct1 = pgnn_layer(idx_p, d1, ff1, fm1, p1["wp"], p1["bp"], tn=tn)

    # TODO(synk): F.dropout between layers is treated as identity (eval mode).

    # ---- conv_out ----
    p2 = prepped["conv_out"]
    d2 = jnp.pad(dist_mlp(dmax, p2["dist"]), ((0, np_ - n), (0, 0)))
    fm2, ff2 = fused_linears(struct1, p2["wm"], p2["wf"], p2["bh"], tn=tn)
    pos2, _ = pgnn_layer(idx_p, d2, ff2, fm2, p2["wp"], p2["bp"], tn=tn)

    x_position = pos2[:n, :]
    # down_task == 'node_classification' and n_nodes is not None -> x_position
    return l2_normalize(x_position, axis=-1)


# ----------------------------------------------------------------------------
# Deterministic parameter init (xavier_uniform with relu gain, zero bias)
# ----------------------------------------------------------------------------
def xavier_uniform(key, shape, gain):
    fan_out, fan_in = shape
    bound = gain * math.sqrt(6.0 / (fan_in + fan_out))
    return jax.random.uniform(key, shape, jnp.float32, -bound, bound)


def init_pgnn_layer_params(key, input_dim, output_dim):
    k1, k2, k3, k4 = jax.random.split(key, 4)
    gain = math.sqrt(2.0)  # calculate_gain('relu')
    return dict(
        dist_w1=xavier_uniform(k1, (output_dim, 1), gain),
        dist_b1=jnp.zeros((output_dim,), jnp.float32),
        dist_w2=xavier_uniform(k2, (1, output_dim), gain),
        dist_b2=jnp.zeros((1,), jnp.float32),
        hidden_w=xavier_uniform(k3, (output_dim, 2 * input_dim), gain),
        hidden_b=jnp.zeros((output_dim,), jnp.float32),
        pos_w=xavier_uniform(k4, (1, output_dim), gain),
        pos_b=jnp.zeros((1,), jnp.float32),
    )


def init_pgnn_params(key, input_dim, feature_dim, hidden_dim, n_classes):
    k1, k2, k3 = jax.random.split(key, 3)
    return dict(
        pre_w=xavier_uniform(k1, (feature_dim, input_dim), math.sqrt(2.0)),
        pre_b=jnp.zeros((feature_dim,), jnp.float32),
        conv_first=init_pgnn_layer_params(k2, feature_dim, hidden_dim),
        conv_out=init_pgnn_layer_params(k3, hidden_dim, n_classes),
    )


# ----------------------------------------------------------------------------
# Pure-JAX reference of the PyTorch forward (eval mode), for validation
# ----------------------------------------------------------------------------
def pgnn_reference(params, x, dists_max, dists_argmax):
    def layer(p, feat, dmax, idx):
        w1 = p["dist_w1"].reshape(-1)
        w2 = p["dist_w2"].reshape(-1)
        d = jnp.tensordot(jnp.maximum(dmax[..., None] * w1 + p["dist_b1"], 0.0),
                          w2, axes=([-1], [0])) + p["dist_b2"].reshape(())
        n, k = idx.shape
        msg = feat[idx.reshape(-1)].reshape(n, k, feat.shape[1]) * d[..., None]
        self_feat = jnp.broadcast_to(feat[:, None, :], (n, k, feat.shape[1]))
        cat = jnp.concatenate([msg, self_feat], axis=-1)
        hidden = jnp.maximum(cat @ p["hidden_w"].T + p["hidden_b"], 0.0)
        pos = (jnp.einsum("nkd,d->nk", hidden, p["pos_w"].reshape(-1))
               + p["pos_b"].reshape(()))
        return pos, jnp.mean(hidden, axis=1)

    feat = x @ params["pre_w"].T + params["pre_b"]
    _, h = layer(params["conv_first"], feat, dists_max, dists_argmax)
    pos, _ = layer(params["conv_out"], h, dists_max, dists_argmax)
    return l2_normalize(pos, axis=-1)


# ----------------------------------------------------------------------------
if __name__ == "__main__":
    N = 16            # n_nodes
    K = 8             # number of anchor sets (dists_max.shape[1])
    INPUT_DIM = 12
    FEATURE_DIM = 16
    HIDDEN_DIM = 32
    N_CLASSES = 4

    root = jax.random.PRNGKey(0)
    kx, kd, ka, kp = jax.random.split(root, 4)

    x = jax.random.normal(kx, (N, INPUT_DIM), jnp.float32)
    dists_max = jax.random.uniform(kd, (N, K), jnp.float32)
    dists_argmax = jax.random.randint(ka, (N, K), 0, N, dtype=jnp.int32)

    params = init_pgnn_params(kp, INPUT_DIM, FEATURE_DIM, HIDDEN_DIM, N_CLASSES)
    prepped = prepare_params(params)

    out = pgnn_forward(prepped, x, dists_max, dists_argmax)
    out = jax.block_until_ready(out)

    assert out.shape == (N, K), out.shape
    assert bool(jnp.all(jnp.isfinite(out))), "non-finite output"

    ref = pgnn_reference(params, x, dists_max, dists_argmax)
    err = float(jnp.max(jnp.abs(out - ref)))
    assert err < 0.1, f"mismatch vs pure-JAX reference: max abs err {err}"

    print("KERNEL_OK")
</pallas_src>

<mosaic_0001>
module attributes {stable_mosaic.version = 11 : i64} {
  func.func @_pre_dual_linear_kernel(%arg0: i32, %arg1: memref<8x128xf32, #tpu.memory_space<vmem>>, %arg2: memref<128x128xf32, #tpu.memory_space<vmem>>, %arg3: memref<1x128xf32, #tpu.memory_space<vmem>>, %arg4: memref<128x128xf32, #tpu.memory_space<vmem>>, %arg5: memref<128x128xf32, #tpu.memory_space<vmem>>, %arg6: memref<1x128xf32, #tpu.memory_space<vmem>>, %arg7: memref<8x128xf32, #tpu.memory_space<vmem>>, %arg8: memref<8x128xf32, #tpu.memory_space<vmem>>) attributes {dimension_semantics = [#tpu.dimension_semantics<parallel>], iteration_bounds = array<i64: 2>, scalar_prefetch = 0 : i64, scratch_operands = 0 : i64, tpu.core_type = #tpu.core_type<tc>, window_params = [{transform_indices = @transform_0, window_bounds = array<i64: 8, 128>}, {pipeline_mode = #tpu.pipeline_mode<synchronous>, transform_indices = @transform_1, window_bounds = array<i64: 128, 128>}, {pipeline_mode = #tpu.pipeline_mode<synchronous>, transform_indices = @transform_2, window_bounds = array<i64: 1, 128>}, {pipeline_mode = #tpu.pipeline_mode<synchronous>, transform_indices = @transform_3, window_bounds = array<i64: 128, 128>}, {pipeline_mode = #tpu.pipeline_mode<synchronous>, transform_indices = @transform_4, window_bounds = array<i64: 128, 128>}, {pipeline_mode = #tpu.pipeline_mode<synchronous>, transform_indices = @transform_5, window_bounds = array<i64: 1, 128>}, {transform_indices = @transform_6, window_bounds = array<i64: 8, 128>}, {transform_indices = @transform_7, window_bounds = array<i64: 8, 128>}]} {
    %c0 = arith.constant 0 : index
    %c0_0 = arith.constant 0 : index
    %0 = vector.load %arg1[%c0, %c0_0] : memref<8x128xf32, #tpu.memory_space<vmem>>, vector<8x128xf32>
    %c0_1 = arith.constant 0 : index
    %c0_2 = arith.constant 0 : index
    %1 = vector.load %arg2[%c0_1, %c0_2] : memref<128x128xf32, #tpu.memory_space<vmem>>, vector<128x128xf32>
    %cst = arith.constant dense<0.000000e+00> : vector<8x128xf32>
    %2 = tpu.matmul %0, %1, %cst {dimension_numbers = #tpu.dot_dimension_numbers<[1], [0], [0], [1], [0, 0, 1, 1], [], []>} : vector<8x128xf32>, vector<128x128xf32>, vector<8x128xf32> -> vector<8x128xf32>
    %c0_3 = arith.constant 0 : index
    %c0_4 = arith.constant 0 : index
    %3 = vector.load %arg3[%c0_3, %c0_4] : memref<1x128xf32, #tpu.memory_space<vmem>>, vector<1x128xf32>
    %4 = vector.broadcast %3 : vector<1x128xf32> to vector<8x128xf32>
    %5 = arith.addf %2, %4 : vector<8x128xf32>
    %c0_5 = arith.constant 0 : index
    %c0_6 = arith.constant 0 : index
    %6 = vector.load %arg4[%c0_5, %c0_6] : memref<128x128xf32, #tpu.memory_space<vmem>>, vector<128x128xf32>
    %cst_7 = arith.constant dense<0.000000e+00> : vector<8x128xf32>
    %7 = tpu.matmul %5, %6, %cst_7 {dimension_numbers = #tpu.dot_dimension_numbers<[1], [0], [0], [1], [0, 0, 1, 1], [], []>} : vector<8x128xf32>, vector<128x128xf32>, vector<8x128xf32> -> vector<8x128xf32>
    %c0_8 = arith.constant 0 : index
    %c0_9 = arith.constant 0 : index
    %8 = vector.load %arg7[%c0_8, %c0_9] : memref<8x128xf32, #tpu.memory_space<vmem>>, vector<8x128xf32>
    tpu.vector_store %arg7[%c0_8, %c0_9], %7 {strides = array<i32>} : memref<8x128xf32, #tpu.memory_space<vmem>>, vector<8x128xf32>,
    %c0_10 = arith.constant 0 : index
    %c0_11 = arith.constant 0 : index
    %9 = vector.load %arg5[%c0_10, %c0_11] : memref<128x128xf32, #tpu.memory_space<vmem>>, vector<128x128xf32>
    %cst_12 = arith.constant dense<0.000000e+00> : vector<8x128xf32>
    %10 = tpu.matmul %5, %9, %cst_12 {dimension_numbers = #tpu.dot_dimension_numbers<[1], [0], [0], [1], [0, 0, 1, 1], [], []>} : vector<8x128xf32>, vector<128x128xf32>, vector<8x128xf32> -> vector<8x128xf32>
    %c0_13 = arith.constant 0 : index
    %c0_14 = arith.constant 0 : index
    %11 = vector.load %arg6[%c0_13, %c0_14] : memref<1x128xf32, #tpu.memory_space<vmem>>, vector<1x128xf32>
    %12 = vector.broadcast %11 : vector<1x128xf32> to vector<8x128xf32>
    %13 = arith.addf %10, %12 : vector<8x128xf32>
    %c0_15 = arith.constant 0 : index
    %c0_16 = arith.constant 0 : index
    %14 = vector.load %arg8[%c0_15, %c0_16] : memref<8x128xf32, #tpu.memory_space<vmem>>, vector<8x128xf32>
    tpu.vector_store %arg8[%c0_15, %c0_16], %13 {strides = array<i32>} : memref<8x128xf32, #tpu.memory_space<vmem>>, vector<8x128xf32>,
    return
  }
  func.func @transform_0(%arg0: i32) -> (i32, i32) {
    %c0_i32 = arith.constant 0 : i32
    %c0_i32_0 = arith.constant 0 : i32
    return %arg0, %c0_i32 : i32, i32
  }
  func.func @transform_1(%arg0: i32) -> (i32, i32) {
    %c0_i32 = arith.constant 0 : i32
    %c0_i32_0 = arith.constant 0 : i32
    %c0_i32_1 = arith.constant 0 : i32
    return %c0_i32, %c0_i32_0 : i32, i32
  }
  func.func @transform_2(%arg0: i32) -> (i32, i32) {
    %c0_i32 = arith.constant 0 : i32
    %c0_i32_0 = arith.constant 0 : i32
    %c0_i32_1 = arith.constant 0 : i32
    return %c0_i32, %c0_i32_0 : i32, i32
  }
  func.func @transform_3(%arg0: i32) -> (i32, i32) {
    %c0_i32 = arith.constant 0 : i32
    %c0_i32_0 = arith.constant 0 : i32
    %c0_i32_1 = arith.constant 0 : i32
    return %c0_i32, %c0_i32_0 : i32, i32
  }
  func.func @transform_4(%arg0: i32) -> (i32, i32) {
    %c0_i32 = arith.constant 0 : i32
    %c0_i32_0 = arith.constant 0 : i32
    %c0_i32_1 = arith.constant 0 : i32
    return %c0_i32, %c0_i32_0 : i32, i32
  }
  func.func @transform_5(%arg0: i32) -> (i32, i32) {
    %c0_i32 = arith.constant 0 : i32
    %c0_i32_0 = arith.constant 0 : i32
    %c0_i32_1 = arith.constant 0 : i32
    return %c0_i32, %c0_i32_0 : i32, i32
  }
  func.func @transform_6(%arg0: i32) -> (i32, i32) {
    %c0_i32 = arith.constant 0 : i32
    %c0_i32_0 = arith.constant 0 : i32
    return %arg0, %c0_i32 : i32, i32
  }
  func.func @transform_7(%arg0: i32) -> (i32, i32) {
    %c0_i32 = arith.constant 0 : i32
    %c0_i32_0 = arith.constant 0 : i32
    return %arg0, %c0_i32 : i32, i32
  }
}

</mosaic_0001>

<bundles_post_ra>
// kernel: tpu_custom_call.1
= control target key start
LH: loop header
LB: loop body
LE: loop exit
PB: predicated region body
PF: predicated region fallthrough
CT: control target
= control target key end

     0   :  { %13 = vsyncpa [#allocation3], 0  ;;  %s1737_s0 = inlined_call_operand.hbm [shape: f32[16,128], index: 0, kind: input, shape index: {}]   ;;  %s1738_s1 = inlined_call_operand.hbm [shape: f32[128,128], index: 1, kind: input, shape index: {}]   ;;  %s1739_s2 = inlined_call_operand.vmem [shape: f32[1,128], index: 2, kind: input, shape index: {}]   ;;  %s1740_s3 = inlined_call_operand.hbm [shape: f32[128,128], index: 3, kind: input, shape index: {}]   ;;  %s1741_s4 = inlined_call_operand.hbm [shape: f32[128,128], index: 4, kind: input, shape index: {}]   ;;  %s1742_s5 = inlined_call_operand.vmem [shape: f32[1,128], index: 5, kind: input, shape index: {}]   ;;  %s1743_s6 = inlined_call_operand.hbm [shape: f32[16,128], index: 6, kind: output, shape index: {0}]   ;;  %s1744_s7 = inlined_call_operand.hbm [shape: f32[16,128], index: 7, kind: output, shape index: {1}]  }
   0x1   :  { %15 = vsyncpa [#allocation3 + $0x1], 0 }
   0x2   :  { %16 = vsyncpa [#allocation6], 0 }
   0x3   :  { %17 = vsyncpa [#allocation9], 0 }
   0x4   :  { %18 = vsyncpa [#allocation4], 0 }
   0x5   :  { %20 = vsyncpa [#allocation4 + $0x1], 0 }
   0x6   :  { %21 = vsyncpa [#allocation12], 0 }
   0x7   :  { %23 = vsyncpa [#allocation12 + $0x1], 0  ;;  %s1398_s24 = smov 0   ;;  %s1400_s25 = smov 0  }
   0x8   :  { %s1402_s26 = smov 0   ;;  %s1404_s27 = smov 0  }
   0x9 LB: > { %s1419_s28 = sadd.s32 4294967295, %s1345_s27   ;;  %s787_s29 = sadd.s32 4294967294, %s1345_s27   ;;  %s1345_s27 = sphi %s1404_s27, %s1770_s27   ;;  %s1341_s26 = sphi %s1402_s26, %s1769_s26   ;;  %s1337_s25 = sphi %s1400_s25, %s1768_s25   ;;  %s1333_s24 = sphi %s1398_s24, %s1767_s24  }
   0xa   : > { %p49_p0 = scmp.ne.s32.totalorder %s1337_s25, %s1333_s24  ;;  %p1745_p1 = scmp.eq.s32.totalorder %s1419_s28, 0 }
   0xb   : > { %p184_p3 = scmp.eq.s32.totalorder %s787_s29, 1  ;;  %p788_p5 = scmp.ge.s32.totalorder %s1345_s27, 1 }
   0xc   : > { %p1428_p4 = por %p1745_p1, %p49_p0  ;;  %p217_p7 = scmp.lt.s32.totalorder %s1345_s27, 3 }
   0xd   : > { %p1433_p6 = por %p184_p3, %p49_p0  ;;  %s1347_s10 = smov [#allocation5]  }
   0xe   : > { %s1749_s30 = scalar_select %p1428_p4, 1, 0 }
   0xf   : > { %s1750_s8 = scalar_select %p1433_p6, 1, 0 }
  0x10   : > { %p1438_p8 = pnand %p788_p5, %p217_p7  ;;  %s229_s11 = sshll.u32 %s1347_s10, 4  ;;  %s1442_s11 = int_to_ptr.vmem [resolvable:$true] %s229_s11 }
  0x11   : > { %1751 = sst [smem:[#allocation18_spill]] %s1750_s8  ;;  %s1348_s13 = smov [#allocation7]  }
  0x12   : > { %s1752_s9 = scalar_select %p1438_p8, 1, 0 }
  0x13   : > { %p1056_p9 = pneg %p1438_p8  ;;  %s245_s14 = sshll.u32 %s1348_s13, 4  ;;  %s1453_s14 = int_to_ptr.vmem [resolvable:$true] %s245_s14 }
  0x14   : > { %s1349_s15 = smov [#allocation8]   ;;  %s1125_s19 = scalar_lea.hbm %s1738_s1, 2048 }
  0x15   : > { %p1449_p11 = pnand %p1056_p9, %p1745_p1  ;;  %s1455_s16 = sshll.u32 %s1349_s15, 4  ;;  %s259_s16 = int_to_ptr.vmem [resolvable:$true] %s1455_s16 }
  0x16   : > { %p1126_p12 = scmp.ne.s32.totalorder %s1738_s1, %s1125_s19  ;;  %p1132_p5 = scmp.lt.u32.totalorder %s1125_s19, %s1738_s1 }
  0x17   : > { %p1465_p13 = pneg %p1449_p11 }
  0x19   : > { %p1128_p0 = pnand %p1465_p13, %p1126_p12 }
  0x1b   : > { %p1129_p3 = pneg %p1128_p0 }
  0x1d   : > { %p1134_p7 = pnand %p1132_p5, %p1129_p3 }
  0x1f   : > { %1137 = shalt.err (!%p1134_p7)
}
  0x20   : > { %s1138_s10 = scalar_lea.vmem %s1442_s11, 2048  ;;  %p1146_p2 = scmp.lt.s32.totalorder %s1442_s11, %s1442_s11 }
  0x21   : > { %p1139_p9 = scmp.ne.s32.totalorder %s1442_s11, %s1138_s10  ;;  %p1147_p6 = scmp.lt.s32.totalorder %s1138_s10, %s1138_s10 }
  0x23   : > { %p1141_p10 = pnand %p1139_p9, %p1465_p13  ;;  %p1148_p12 = por %p1147_p6, %p1146_p2 }
  0x25   : > { %p1142_p1 = pneg %p1141_p10 }
  0x27   : > { %p1149_p0 = pnand %p1148_p12, %p1142_p1 }
  0x29   : > { %1152 = shalt.err (!%p1149_p0)
}
  0x2a   : > { %s1350_s13 = smov 128   ;;  %s1351_s15 = smov 8  }
  0x2b   : > { %1059 = dma.hbm_to_vmem [thread:$0]  (!%p1449_p11), %s1738_s1, 2048, %s1442_s11, [#allocation6], %s1350_s13, %s1350_s13, %s1351_s15  }
  0x2c   : > { %s1153_s21 = scalar_lea.hbm %s1740_s3, 2048 }
  0x2d   : > { %p1154_p1 = scmp.ne.s32.totalorder %s1740_s3, %s1153_s21  ;;  %p1160_p10 = scmp.lt.u32.totalorder %s1153_s21, %s1740_s3 }
  0x2f   : > { %p1156_p2 = pnand %p1154_p1, %p1465_p13 }
  0x31   : > { %p1157_p6 = pneg %p1156_p2 }
  0x33   : > { %p1162_p3 = pnand %p1160_p10, %p1157_p6 }
  0x35   : > { %1165 = shalt.err (!%p1162_p3)
}
  0x36   : > { %s1166_s11 = scalar_lea.vmem %s1453_s14, 2048  ;;  %p1174_p12 = scmp.lt.s32.totalorder %s1453_s14, %s1453_s14 }
  0x37   : > { %p1167_p5 = scmp.ne.s32.totalorder %s1453_s14, %s1166_s11  ;;  %p1175_p0 = scmp.lt.s32.totalorder %s1166_s11, %s1166_s11 }
  0x39   : > { %p1169_p7 = pnand %p1167_p5, %p1465_p13  ;;  %p1176_p1 = por %p1175_p0, %p1174_p12 }
  0x3b   : > { %p1170_p9 = pneg %p1169_p7 }
  0x3d   : > { %p1177_p2 = pnand %p1176_p1, %p1170_p9 }
  0x3f   : > { %1180 = shalt.err (!%p1177_p2)
}
  0x40   : > { %1062 = dma.hbm_to_vmem [thread:$0]  (!%p1449_p11), %s1740_s3, 2048, %s1453_s14, [#allocation6], %s1350_s13, %s1350_s13, %s1351_s15  }
  0x41   : > { %s1181_s20 = scalar_lea.hbm %s1741_s4, 2048 }
  0x42   : > { %p1182_p6 = scmp.ne.s32.totalorder %s1741_s4, %s1181_s20  ;;  %p1188_p5 = scmp.lt.u32.totalorder %s1181_s20, %s1741_s4 }
  0x44   : > { %p1184_p10 = pnand %p1182_p6, %p1465_p13 }
  0x46   : > { %p1185_p3 = pneg %p1184_p10 }
  0x48   : > { %p1190_p7 = pnand %p1188_p5, %p1185_p3 }
  0x4a   : > { %1193 = shalt.err (!%p1190_p7)
}
  0x4b   : > { %s1194_s11 = scalar_lea.vmem %s259_s16, 2048  ;;  %p1202_p1 = scmp.lt.s32.totalorder %s259_s16, %s259_s16 }
  0x4c   : > { %p1195_p9 = scmp.ne.s32.totalorder %s259_s16, %s1194_s11  ;;  %p1203_p2 = scmp.lt.s32.totalorder %s1194_s11, %s1194_s11 }
  0x4e   : > { %p1197_p12 = pnand %p1195_p9, %p1465_p13  ;;  %p1204_p4 = por %p1203_p2, %p1202_p1 }
  0x50   : > { %p1198_p0 = pneg %p1197_p12 }
  0x52   : > { %p1205_p8 = pnand %p1204_p4, %p1198_p0 }
  0x54   : > { %1208 = shalt.err (!%p1205_p8)
}
  0x55   : > { %1065 = dma.hbm_to_vmem [thread:$0]  (!%p1449_p11), %s1741_s4, 2048, %s259_s16, [#allocation9], %s1350_s13, %s1350_s13, %s1351_s15  }
  0x56   : > { %s1538_s22 = sadd.s32 1, %s1345_s27   ;;  %s36_s17 = sadd.s32 1, %s1341_s26 }
  0x57   : > { %s33_s12 = ssub.s32 %s1345_s27, %s1538_s22  ;;  %p43_p8 = scmp.ne.s32.totalorder %s1341_s26, %s1337_s25 }
  0x58   : > { %p34_p4 = scmp.eq.s32.totalorder %s33_s12, 0  ;;  %p44_p13 = scmp.eq.s32.totalorder %s1345_s27, 0 }
  0x59   : > { %p1080_p6 = scmp.lt.s32.totalorder %s1345_s27, 2  ;;  %p1755_p3 = scmp.eq.s32.totalorder %s1419_s28, 1 }
  0x5a   : > { %s1548_s18 = scalar_select %p34_p4, %s1341_s26, %s36_s17  }
  0x5b   : > { %p45_p10 = por %p44_p13, %p43_p8  ;;  %p1552_p5 = por %p1755_p3, %p43_p8 }
  0x5c   : > { %s275_s20 = sand.u32 1, %s1341_s26   ;;  %s794_s21 = sshll.u32 %s1345_s27, 7 }
  0x5d   : > { %s793_s16 = sshll.u32 %s275_s20, 3  ;;  %s1561_s23 = scalar_lea.hbm %s1737_s0, %s794_s21 }
  0x5e   : > { %s279_s29 = scalar_lea.vmem [#allocation2], %s793_s16  ;;  %p1563_p11 = pnand %p1080_p6, %p45_p10 }
  0x5f   : > { %s286_s10 = sshll.u32 %s279_s29, 4  ;;  %s276_s14 = scalar_lea.sflag [#allocation3], %s275_s20  ;;  %s1567_s10 = int_to_ptr.vmem [resolvable:$true] %s286_s10 }
  0x60   : > { %s1209_s8 = scalar_lea.hbm %s1561_s23, 128  ;;  %p1211_p9 = pneg %p1563_p11 }
  0x61   : > { %p1210_p7 = scmp.ne.s32.totalorder %s1561_s23, %s1209_s8  ;;  %s1214_s21 = scalar_lea.hbm %s1737_s0, 256 }
  0x62   : > { %p1215_p1 = scmp.lt.u32.totalorder %s1561_s23, %s1737_s0  ;;  %p1216_p2 = scmp.lt.u32.totalorder %s1214_s21, %s1209_s8 }
  0x63   : > { %p1212_p12 = pnand %p1211_p9, %p1210_p7  ;;  %p1218_p8 = scmp.lt.u32.totalorder %s1209_s8, %s1561_s23 }
  0x64   : > { %p1217_p4 = por %p1216_p2, %p1215_p1 }
  0x65   : > { %p1213_p0 = pneg %p1212_p12 }
  0x66   : > { %p1219_p13 = por %p1218_p8, %p1217_p4 }
  0x68   : > { %p1220_p6 = pnand %p1219_p13, %p1213_p0 }
  0x6a   : > { %1223 = shalt.err (!%p1220_p6)
}
  0x6b   : > { %s1224_s20 = scalar_lea.vmem %s1567_s10, 128  ;;  %s1352_s15 = smov [#allocation2]  }
  0x6c   : > { %p1225_p10 = scmp.ne.s32.totalorder %s1567_s10, %s1224_s20  ;;  %s1229_s29 = sshll.u32 %s1352_s15, 4  ;;  %s1230_s29 = int_to_ptr.vmem [resolvable:$false] %s1229_s29 }
  0x6d   : > { %s1231_s12 = scalar_lea.vmem %s1230_s29, 256  ;;  %p1232_p12 = scmp.lt.s32.totalorder %s1567_s10, %s1230_s29 }
  0x6e   : > { %p1227_p3 = pnand %p1225_p10, %p1211_p9  ;;  %p1233_p1 = scmp.lt.s32.totalorder %s1231_s12, %s1224_s20 }
  0x70   : > { %p1228_p7 = pneg %p1227_p3  ;;  %p1234_p2 = por %p1233_p1, %p1232_p12 }
  0x72   : > { %p1235_p4 = pnand %p1234_p2, %p1228_p7 }
  0x74   : > { %1238 = shalt.err (!%p1235_p4)
}
  0x75   : > { %1069 = dma.hbm_to_vmem [thread:$0]  (!%p1563_p11), %s1561_s23, 128, %s1567_s10, %s276_s14  }
  0x76   : > { %p1758_p0 = scmp.ne.s32.totalorder %s1752_s9, 0 }
  0x77   : > { %s1597_s8 = sand.u32 (!%p1758_p0), 1, %s1337_s25   ;;  %p1759_p9 = scmp.ne.s32.totalorder (!%p1758_p0), %s1749_s30, 0 }
  0x78   : > { %295 = sbr.rel (%p1758_p0) target bundleno = 639 (0x27f), region = 44  ;;  %s1600_s17 = sshll.u32 (!%p1758_p0), %s1597_s8, 3 }
  0x79   : > { %s298_s21 = scalar_lea.sflag (!%p1758_p0), [#allocation3], %s1597_s8  ;;  %s301_s16 = scalar_lea.vmem (!%p1758_p0), [#allocation2], %s1600_s17 }
  0x7f   : > { %1312 = dma.done.wait (%p1759_p9), %s298_s21, 128  }
  0x80   : > { %1314 = vsyncadd (%p1759_p9), %s298_s21, 4294967168  ;;  %p1760_p11 = scmp.eq.s32.totalorder %s1419_s28, 0 }
  0x82   : > { %1316 = dma.done.wait (%p1760_p11), [#allocation6], 4096   ;;  %p1761_p8 = pmov %p1760_p11 }
  0x84   : > { %1318 = vsyncadd (%p1761_p8), [#allocation6], 4294963200  ;;  %p1762_p13 = pmov %p1761_p8 }
  0x85   : > { %p1763_p6 = pmov %p1761_p8 }
  0x86   : > { %1320 = dma.done.wait (%p1762_p13), [#allocation9], 2048  }
  0x87   : > { %1322 = vsyncadd (%p1763_p6), [#allocation9], 4294965248  ;;  %v1353_v0 = vmov 0.0|0.0   ;;  %vm1354_vm0 = vmmov 0   ;;  %v1355_v1 = vmov 0.0   ;;  %v350_v2 = vld [vmem:[#allocation5] sm:$0xff] }
  0x88   : > { %966 = vmatprep.subr.bf16.mxu0 %v1353_v0  ;;  %893 = vmatprep.mubr.msk.f32.mxu0 %vm1354_vm0, %v1355_v1  ;;  %v351_v3 = vld [vmem:[#allocation5 + $0x8] sm:$0xff]  ;;  %v352_v4 = vld [vmem:[#allocation5 + $0x10] sm:$0xff]  ;;  %v353_v6 = vld [vmem:[#allocation5 + $0x18] sm:$0xff]  ;;  %s341_s23 = scalar_lea.vmem [#allocation10], %s1600_s17  ;;  %s806_s11 = sshll.u32 %s1419_s28, 7 }
  0x89   : > { %990 = vmatprep.subr.bf16.mxu1 %v1353_v0  ;;  %928 = vmatprep.mubr.msk.f32.mxu1 %vm1354_vm0, %v1355_v1  ;;  %v967_v5 = vpack.c.bf16 %v351_v3, %v350_v2  ;;  %v970_v7 = vpack.c.bf16 %v353_v6, %v352_v4  ;;  %v354_v8 = vld [vmem:[#allocation5 + $0x20] sm:$0xff]  ;;  %v355_v9 = vld [vmem:[#allocation5 + $0x28] sm:$0xff]  ;;  %v445_v14 = vld [vmem:[#allocation7 + $0x10] sm:$0xff]  ;;  %s643_s10 = sshll.u32 %s341_s23, 4  ;;  %s348_s20 = scalar_lea.vmem [#allocation11], %s1600_s17  ;;  %s1653_s10 = int_to_ptr.vmem [resolvable:$true] %s643_s10 }
  0x8a   : > { %v443_v10 = vld [vmem:[#allocation7] sm:$0xff]  ;;  %v444_v11 = vld [vmem:[#allocation7 + $0x8] sm:$0xff]  ;;  %v973_v12 = vpack.c.bf16 %v355_v9, %v354_v8  ;;  %v446_v15 = vld [vmem:[#allocation7 + $0x18] sm:$0xff]  ;;  %s656_s15 = sshll.u32 %s348_s20, 4  ;;  %s1664_s21 = scalar_lea.hbm %s1743_s6, %s806_s11  ;;  %s1671_s15 = int_to_ptr.vmem [resolvable:$true] %s656_s15 }
  0x8b   : > { %968 = vmatpush3.bf16.msra.mxu0 %v967_v5  ;;  %v991_v13 = vpack.c.bf16 %v444_v11, %v443_v10  ;;  %v356_v16 = vld [vmem:[#allocation5 + $0x30] sm:$0xff]  ;;  %v357_v17 = vld [vmem:[#allocation5 + $0x38] sm:$0xff]  ;;  %v994_v18 = vpack.c.bf16 %v446_v15, %v445_v14  ;;  %v447_v19 = vld [vmem:[#allocation7 + $0x20] sm:$0xff]  ;;  %s1669_s30 = scalar_lea.hbm %s1744_s7, %s806_s11  ;;  %s625_s9 = scalar_lea.sflag [#allocation4], %s1597_s8 }
  0x8c   : > { %969 = vmatprep.subr.bf16.mxu0 %v1353_v0  ;;  %v448_v20 = vld [vmem:[#allocation7 + $0x28] sm:$0xff]  ;;  %v976_v21 = vpack.c.bf16 %v357_v17, %v356_v16  ;;  %v358_v22 = vld [vmem:[#allocation5 + $0x40] sm:$0xff]  ;;  %v449_v25 = vld [vmem:[#allocation7 + $0x30] sm:$0xff]  ;;  %s1239_s14 = scalar_lea.vmem %s1653_s10, 128  ;;  %s1356_s13 = smov [#allocation10]  }
  0x8d   : > { %992 = vmatpush3.bf16.msra.mxu1 %v991_v13  ;;  %v359_v23 = vld [vmem:[#allocation5 + $0x48] sm:$0xff]  ;;  %v997_v24 = vpack.c.bf16 %v448_v20, %v447_v19  ;;  %v450_v26 = vld [vmem:[#allocation7 + $0x38] sm:$0xff]  ;;  %v360_v28 = vld [vmem:[#allocation5 + $0x50] sm:$0xff]  ;;  %p1240_p10 = scmp.ne.s32.totalorder %s1653_s10, %s1239_s14  ;;  %s1243_s29 = sshll.u32 %s1356_s13, 4  ;;  %s1244_s29 = int_to_ptr.vmem [resolvable:$false] %s1243_s29 }
  0x8e   : > { %993 = vmatprep.subr.bf16.mxu1 %v1353_v0  ;;  %v979_v27 = vpack.c.bf16 %v359_v23, %v358_v22  ;;  %v361_v29 = vld [vmem:[#allocation5 + $0x58] sm:$0xff]  ;;  %v1000_v30 = vpack.c.bf16 %v450_v26, %v449_v25  ;;  %v451_v31 = vld [vmem:[#allocation7 + $0x40] sm:$0xff]  ;;  %v452_v32 = vld [vmem:[#allocation7 + $0x48] sm:$0xff]  ;;  %p1246_p12 = scmp.lt.s32.totalorder %s1653_s10, %s1244_s29 }
  0x8f   : > { %971 = vmatpush3.bf16.msra.mxu0 %v970_v7  ;;  %v982_v33 = vpack.c.bf16 %v361_v29, %v360_v28  ;;  %v362_v34 = vld [vmem:[#allocation5 + $0x60] sm:$0xff]  ;;  %v363_v35 = vld [vmem:[#allocation5 + $0x68] sm:$0xff]  ;;  %v1003_v36 = vpack.c.bf16 %v452_v32, %v451_v31  ;;  %v453_v37 = vld [vmem:[#allocation7 + $0x50] sm:$0xff]  ;;  %p1241_p3 = pnand %p1240_p10, %p1552_p5 }
  0x90   : > { %972 = vmatprep.subr.bf16.mxu0 %v1353_v0  ;;  %v454_v38 = vld [vmem:[#allocation7 + $0x58] sm:$0xff]  ;;  %v985_v39 = vpack.c.bf16 %v363_v35, %v362_v34  ;;  %v364_v40 = vld [vmem:[#allocation5 + $0x70] sm:$0xff]  ;;  %v455_v43 = vld [vmem:[#allocation7 + $0x60] sm:$0xff] }
  0x91   : > { %995 = vmatpush3.bf16.msra.mxu1 %v994_v18  ;;  %v365_v41 = vld [vmem:[#allocation5 + $0x78] sm:$0xff]  ;;  %v1006_v42 = vpack.c.bf16 %v454_v38, %v453_v37  ;;  %v456_v44 = vld [vmem:[#allocation7 + $0x68] sm:$0xff]  ;;  %v530_v46 = vld [vmem:[#allocation8] sm:$0xff]  ;;  %p1242_p7 = pneg %p1241_p3 }
  0x92   : > { %996 = vmatprep.subr.bf16.mxu1 %v1353_v0  ;;  %v988_v45 = vpack.c.bf16 %v365_v41, %v364_v40  ;;  %v531_v47 = vld [vmem:[#allocation8 + $0x8] sm:$0xff]  ;;  %v1009_v48 = vpack.c.bf16 %v456_v44, %v455_v43  ;;  %v349_v49 = vld [vmem:[%s301_s16] sm:$0xff]  ;;  %v534_v54 = vld [vmem:[#allocation8 + $0x20] sm:$0xff] }
  0x93   : > { %974 = vmatpush3.bf16.msra.mxu0 %v973_v12  ;;  %v1015_v50 = vpack.c.bf16 %v531_v47, %v530_v46  ;;  %v532_v51 = vld [vmem:[#allocation8 + $0x10] sm:$0xff]  ;;  %v533_v52 = vld [vmem:[#allocation8 + $0x18] sm:$0xff]  ;;  %v535_v55 = vld [vmem:[#allocation8 + $0x28] sm:$0xff] }
  0x94   : > { %975 = vmatprep.subr.bf16.mxu0 %v1353_v0  ;;  %v1018_v53 = vpack.c.bf16 %v533_v52, %v532_v51  ;;  %v1021_v56 = vpack.c.bf16 %v535_v55, %v534_v54  ;;  %v536_v57 = vld [vmem:[#allocation8 + $0x30] sm:$0xff]  ;;  %v537_v58 = vld [vmem:[#allocation8 + $0x38] sm:$0xff]  ;;  %v538_v60 = vld [vmem:[#allocation8 + $0x40] sm:$0xff] }
  0x95   : > { %998 = vmatpush3.bf16.msra.mxu1 %v997_v24  ;;  %v1024_v59 = vpack.c.bf16 %v537_v58, %v536_v57  ;;  %v539_v61 = vld [vmem:[#allocation8 + $0x48] sm:$0xff]  ;;  %v540_v63 = vld [vmem:[#allocation8 + $0x50] sm:$0xff]  ;;  %v542_v3 = vld [vmem:[#allocation8 + $0x60] sm:$0xff] }
  0x96   : > { %999 = vmatprep.subr.bf16.mxu1 %v1353_v0  ;;  %v1027_v62 = vpack.c.bf16 %v539_v61, %v538_v60  ;;  %v543_v4 = vld [vmem:[#allocation8 + $0x68] sm:$0xff]  ;;  %v457_v6 = vld [vmem:[#allocation7 + $0x70] sm:$0xff]  ;;  %v458_v7 = vld [vmem:[#allocation7 + $0x78] sm:$0xff] }
  0x97   : > { %977 = vmatpush3.bf16.msra.mxu0 %v976_v21  ;;  %v1033_v5 = vpack.c.bf16 %v543_v4, %v542_v3  ;;  %v544_v8 = vld [vmem:[#allocation8 + $0x70] sm:$0xff]  ;;  %v1012_v9 = vpack.c.bf16 %v458_v7, %v457_v6  ;;  %v545_v10 = vld [vmem:[#allocation8 + $0x78] sm:$0xff] }
  0x98   : > { %978 = vmatprep.subr.bf16.mxu0 %v1353_v0  ;;  %v1036_v11 = vpack.c.bf16 %v545_v10, %v544_v8  ;;  %v802_v12 = vld [vmem:[%s1739_s2] ss:$0 sm:$0xff] }
  0x99   : > { %1001 = vmatpush3.bf16.msra.mxu1 %v1000_v30 }
  0x9a   : > { %1002 = vmatprep.subr.bf16.mxu1 %v1353_v0 }
  0x9b   : > { %980 = vmatpush3.bf16.msra.mxu0 %v979_v27 }
  0x9c   : > { %981 = vmatprep.subr.bf16.mxu0 %v1353_v0 }
  0x9d   : > { %1004 = vmatpush3.bf16.msra.mxu1 %v1003_v36 }
  0x9e   : > { %1005 = vmatprep.subr.bf16.mxu1 %v1353_v0 }
  0x9f   : > { %983 = vmatpush3.bf16.msra.mxu0 %v982_v33 }
  0xa0   : > { %984 = vmatprep.subr.bf16.mxu0 %v1353_v0 }
  0xa1   : > { %1007 = vmatpush3.bf16.msra.mxu1 %v1006_v42 }
  0xa2   : > { %1008 = vmatprep.subr.bf16.mxu1 %v1353_v0 }
  0xa3   : > { %986 = vmatpush3.bf16.msra.mxu0 %v985_v39 }
  0xa4   : > { %987 = vmatprep.subr.bf16.mxu0 %v1353_v0 }
  0xa5   : > { %1010 = vmatpush3.bf16.msra.mxu1 %v1009_v48 }
  0xa6   : > { %1011 = vmatprep.subr.bf16.mxu1 %v1353_v0 }
  0xa7   : > { %989 = vmatpush3.bf16.msra.mxu0 %v988_v45 }
  0xa8   : > { %1014 = vmatprep.subr.bf16.mxu0 %v1353_v0 }
  0xa9   : > { %1013 = vmatpush3.bf16.msra.mxu1 %v1012_v9 }
  0xaa   : > { %894 = vmatmul.mubr.f32.vlgmr.msra.gmra.mrb[0].mxu0 %v349_v49 }
  0xab   : > { %1016 = vmatpush3.bf16.msra.mxu0 %v1015_v50  ;;  %963 = vmatprep.mubr.msk.f32.mxu0 %vm1354_vm0, %v1355_v1  ;;  %v541_v1 = vld [vmem:[#allocation8 + $0x58] sm:$0xff] }
  0xac   : > { %1017 = vmatprep.subr.bf16.mxu0 %v1353_v0  ;;  %v1030_v2 = vpack.c.bf16 %v541_v1, %v540_v63 }
  0xaf   : > { %1019 = vmatpush3.bf16.msra.mxu0 %v1018_v53 }
  0xb0   : > { %1020 = vmatprep.subr.bf16.mxu0 %v1353_v0 }
  0xb3   : > { %1022 = vmatpush3.bf16.msra.mxu0 %v1021_v56 }
  0xb4   : > { %1023 = vmatprep.subr.bf16.mxu0 %v1353_v0 }
  0xb7   : > { %1025 = vmatpush3.bf16.msra.mxu0 %v1024_v59 }
  0xb8   : > { %1026 = vmatprep.subr.bf16.mxu0 %v1353_v0 }
  0xbb   : > { %1028 = vmatpush3.bf16.msra.mxu0 %v1027_v62 }
  0xbc   : > { %1029 = vmatprep.subr.bf16.mxu0 %v1353_v0 }
  0xbf   : > { %1031 = vmatpush3.bf16.msra.mxu0 %v1030_v2 }
  0xc0   : > { %1032 = vmatprep.subr.bf16.mxu0 %v1353_v0 }
  0xc3   : > { %1034 = vmatpush3.bf16.msra.mxu0 %v1033_v5 }
  0xc4   : > { %1035 = vmatprep.subr.bf16.mxu0 %v1353_v0  ;;  %v803_v0 = vld [vmem:[%s1742_s5] ss:$0 sm:$0xff] }
  0xc7   : > { %1037 = vmatpush3.bf16.msra.mxu0 %v1036_v11 }
 0x17d   : > { %v439_v13 = vpop.f32.mrb[0].mxu0 }
 0x17e   : > { %v440_v14 = vadd.f32 %v802_v12, %v439_v13  ;;  %v895_v15 = vpop.f32.mrb[1].mxu0 }
 0x180   : > { %929 = vmatmul.mubr.f32.vlgmr.msra.gmra.mrb[0].mxu1 %v440_v14  ;;  %964 = vmatmul.mubr.f32.vlgmr.msra.gmra.mrb[2].mxu0 %v440_v14 }
 0x253   : > { %v525_v16 = vpop.f32.mrb[0].mxu1  ;;  %v619_v17 = vpop.f32.mrb[2].mxu0 }
 0x254   : > { %529 = vst [vmem:[%s341_s23] sm:$0xff] %v525_v16  ;;  %v620_v18 = vadd.f32 %v803_v0, %v619_v17  ;;  %v930_v19 = vpop.f32.mrb[1].mxu1  ;;  %v965_v20 = vpop.f32.mrb[3].mxu0  ;;  %s1245_s23 = scalar_lea.vmem %s1244_s29, 256 }
 0x255   : > { %p1247_p1 = scmp.lt.s32.totalorder %s1245_s23, %s1239_s14 }
 0x257   : > { %p1248_p2 = por %p1247_p1, %p1246_p12 }
 0x259   : > { %p1249_p4 = pnand %p1248_p2, %p1242_p7 }
 0x25b   : > { %1252 = shalt.err (!%p1249_p4)
}
 0x25c   : > { %s1253_s11 = scalar_lea.hbm %s1664_s21, 128  ;;  %s1257_s16 = scalar_lea.hbm %s1743_s6, 256 }
 0x25d   : > { %p1254_p0 = scmp.ne.s32.totalorder %s1664_s21, %s1253_s11  ;;  %p1258_p8 = scmp.lt.u32.totalorder %s1664_s21, %s1743_s6 }
 0x25e   : > { %p1259_p13 = scmp.lt.u32.totalorder %s1257_s16, %s1253_s11  ;;  %p1261_p10 = scmp.lt.u32.totalorder %s1253_s11, %s1664_s21 }
 0x25f   : > { %p1255_p9 = pnand %p1254_p0, %p1552_p5 }
 0x260   : > { %p1260_p6 = por %p1259_p13, %p1258_p8 }
 0x261   : > { %p1256_p11 = pneg %p1255_p9 }
 0x262   : > { %p1262_p3 = por %p1261_p10, %p1260_p6 }
 0x264   : > { %p1263_p7 = pnand %p1262_p3, %p1256_p11 }
 0x266   : > { %1266 = shalt.err (!%p1263_p7)
}
 0x267   : > { %1052 = dma.vmem_to_hbm [thread:$0]  (%p1552_p5), %s1653_s10, 128, %s1664_s21, %s625_s9   ;;  %623 = vst [vmem:[%s348_s20] sm:$0xff] %v620_v18 }
 0x268   : > { %s630_s14 = scalar_lea.sflag [#allocation12], %s1597_s8  ;;  %s1267_s23 = scalar_lea.vmem %s1671_s15, 128 }
 0x269   : > { %p1268_p12 = scmp.ne.s32.totalorder %s1671_s15, %s1267_s23  ;;  %s1357_s11 = smov [#allocation11]  }
 0x26a   : > { %s1271_s12 = sshll.u32 %s1357_s11, 4  ;;  %s1272_s12 = int_to_ptr.vmem [resolvable:$false] %s1271_s12 }
 0x26b   : > { %p1269_p1 = pnand %p1268_p12, %p1552_p5  ;;  %s1273_s28 = scalar_lea.vmem %s1272_s12, 256 }
 0x26c   : > { %p1274_p4 = scmp.lt.s32.totalorder %s1671_s15, %s1272_s12  ;;  %p1275_p0 = scmp.lt.s32.totalorder %s1273_s28, %s1267_s23 }
 0x26d   : > { %p1270_p2 = pneg %p1269_p1 }
 0x26e   : > { %p1276_p9 = por %p1275_p0, %p1274_p4 }
 0x270   : > { %p1277_p11 = pnand %p1276_p9, %p1270_p2 }
 0x272   : > { %1280 = shalt.err (!%p1277_p11)
}
 0x273   : > { %s1281_s8 = scalar_lea.hbm %s1669_s30, 128  ;;  %s1285_s20 = scalar_lea.hbm %s1744_s7, 256 }
 0x274   : > { %p1282_p8 = scmp.ne.s32.totalorder %s1669_s30, %s1281_s8  ;;  %p1286_p10 = scmp.lt.u32.totalorder %s1669_s30, %s1744_s7 }
 0x275   : > { %p1287_p3 = scmp.lt.u32.totalorder %s1285_s20, %s1281_s8  ;;  %p1289_p12 = scmp.lt.u32.totalorder %s1281_s8, %s1669_s30 }
 0x276   : > { %p1283_p13 = pnand %p1282_p8, %p1552_p5 }
 0x277   : > { %p1288_p7 = por %p1287_p3, %p1286_p10 }
 0x278   : > { %p1284_p6 = pneg %p1283_p13 }
 0x279   : > { %p1290_p1 = por %p1289_p12, %p1288_p7 }
 0x27b   : > { %p1291_p2 = pnand %p1290_p1, %p1284_p6 }
 0x27d   : > { %1294 = shalt.err (!%p1291_p2)
}
 0x27e   : > { %1053 = dma.vmem_to_hbm [thread:$0]  (%p1552_p5), %s1671_s15, 128, %s1669_s30, %s630_s14  }
 0x27f PF: > { %s1764_s16 = sld [smem:[#allocation18_spill]]  ;;  %s668_s13 = sand.u32 1, %s1333_s24  }
 0x280   : > { %p1766_p0 = scmp.ge.s32.totalorder %s1345_s27, 2  ;;  %s669_s29 = scalar_lea.sflag [#allocation4], %s668_s13 }
 0x285   : > { %p1765_p4 = scmp.ne.s32.totalorder %s1764_s16, 0 }
 0x287   : > { %p1071_p9 = pnand %p1766_p0, %p1765_p4 }
 0x289   : > { %1324 = dma.done.wait (!%p1071_p9), %s669_s29, 128  }
 0x28a   : > { %1326 = vsyncadd (!%p1071_p9), %s669_s29, 4294967168  ;;  %s678_s23 = scalar_lea.sflag [#allocation12], %s668_s13 }
 0x28b   : > { %1328 = dma.done.wait (!%p1071_p9), %s678_s23, 128  }
 0x28c   : > { %1330 = vsyncadd (!%p1071_p9), %s678_s23, 4294967168  ;;  %p26_p5 = scmp.ge.s32.totalorder %s1538_s22, 4   ;;  %s1767_s24 = smov %s1337_s25 }
 0x28d   : > { %s1768_s25 = smov %s1341_s26  ;;  %s1769_s26 = smov %s1548_s18 }
 0x28e   : > { %s1770_s27 = smov %s1538_s22  ;;  %28 = sbr.rel (!%p26_p5) target bundleno = 9 (0x9), region = 118 }
 0x295   :  { %683 = vsyncpa [#allocation3], 1 }
 0x296   :  { %685 = vsyncpa [#allocation3 + $0x1], 1 }
 0x297   :  { %686 = vsyncpa [#allocation6], 1 }
 0x298   :  { %687 = vsyncpa [#allocation9], 1 }
 0x299   :  { %688 = vsyncpa [#allocation4], 1 }
 0x29a   :  { %690 = vsyncpa [#allocation4 + $0x1], 1 }
 0x29b   :  { %691 = vsyncpa [#allocation12], 1 }
 0x29c   :  { %693 = vsyncpa [#allocation12 + $0x1], 1 }

</bundles_post_ra>
